<compile_context>
chip_gen: v6e
topology: v6e:2x2x1
jax: 0.10.0
libtpu: 0.0.40
codegen_flags: <defaults>
</compile_context>

<pallas_src>
import functools
import math

import jax
import jax.numpy as jnp
from jax.experimental import pallas as pl
from jax.experimental.pallas import tpu as pltpu


# ----------------------------- Pallas kernel ------------------------------ #

def eps_edm_kernel(scal_ref, x_ref, w1s_ref, bias_ref, w2t_ref, b2_ref, o_ref,
                   *, sub):
    """Fused eps_edm forward.

    scal_ref : (2, B) f32 SMEM   row 0 = 1/sigma, row 1 = mu/sigma
    x_ref    : (b_blk, C, tile)  raw x tokens (lanes = spatial tokens)
    w1s_ref  : (b_blk, hidden, C)  per-sample W1^T / mu_b
    bias_ref : (b_blk, hidden, 1)  per-sample b1 + (sigma/mu)_b * emb
    w2t_ref  : (C, hidden)
    b2_ref   : (C, 1)
    o_ref    : (b_blk, C, tile)
    """
    b_blk, _, tile = x_ref.shape
    n_sub = tile // sub

    w2t = w2t_ref[...]          # (C, hidden)  -- loop-invariant, load once
    b2 = b2_ref[...]            # (C, 1)

    for bi in range(b_blk):     # static unroll over samples in this block
        b = pl.program_id(0) * b_blk + bi          # global sample index
        inv_sigma = scal_ref[0, b]                  # 1 / sigma_b
        r = scal_ref[1, b]                          # mu_b / sigma_b
        w1s = w1s_ref[bi]                           # (hidden, C)
        bias = bias_ref[bi]                         # (hidden, 1)

        def token_chunk(start, bi=bi, inv_sigma=inv_sigma, r=r,
                        w1s=w1s, bias=bias):
            x = x_ref[bi, :, pl.ds(start, sub)]     # (C, sub)
            # D(x/mu, sigma/mu):  W1s @ x == W1^T @ (x / mu)
            h = jnp.dot(w1s, x, preferred_element_type=jnp.float32) + bias
            h = jax.nn.gelu(h, approximate=True)    # tanh gelu -> EUP slot
            d = jnp.dot(w2t, h, preferred_element_type=jnp.float32) + b2
            # mu/sigma * (x/mu - D) == (1/sigma)*x - (mu/sigma)*D
            o_ref[bi, :, pl.ds(start, sub)] = (
                inv_sigma * x - r * d).astype(o_ref.dtype)

        if n_sub == 1:
            token_chunk(0)
        else:
            # Sub-chunk tokens so the (hidden, sub) intermediate never spills
            # even when the DMA tile is tens of thousands of tokens.
            @pl.loop(0, n_sub)
            def _(s):
                token_chunk(pl.multiple_of(s * sub, 128))


# ------------------------------- wrapper ----------------------------------- #

def alpha_cos(t, eta):
    return jnp.cos(math.acos(math.sqrt(eta)) * t) ** 2


def _largest_divisor_le(n, cap):
    for cand in range(min(n, max(cap, 1)), 0, -1):
        if n % cand == 0:
            return cand
    return 1


def _choose_tile_hw(HW, cap):
    """Largest multiple-of-128 divisor of HW that is <= cap, else HW."""
    if HW <= cap:
        return HW
    t = (cap // 128) * 128
    while t >= 128:
        if HW % t == 0:
            return t
        t -= 128
    return HW   # no lane-aligned divisor: whole row per step (still correct)


def _choose_sub(tile):
    for s in (512, 256, 128):
        if tile % s == 0:
            return s
    return tile


def eps_edm_forward(x_nchw, t, params, *, eta=1e-3, tokens_per_step=32768):
    """x_nchw: (B, C, H, W) float32, t: (B,) float32.

    tokens_per_step is the DMA-tile budget (tokens per grid step); 16K-64K
    keeps each step ~0.5-1 MiB of HBM traffic and near the roofline while
    fitting v7x's smaller VMEM.
    """
    B, C, H, W = x_nchw.shape
    w1, b1, emb, w2, b2 = params
    hidden = w1.shape[1]
    HW = H * W

    # ---- tile / batch-block selection (HBM-roofline driven) ----
    if HW >= tokens_per_step:
        b_blk = 1
        tile_hw = _choose_tile_hw(HW, tokens_per_step)
    else:
        # Small-problem path: pack several samples into one grid step to
        # amortize the fixed per-step overhead.
        b_blk = _largest_divisor_le(B, tokens_per_step // HW)
        tile_hw = HW

    # Keep >= 2 total grid steps when possible (v7x megacore: 2 TensorCores).
    if (B // b_blk) * (HW // tile_hw) < 2:
        if b_blk > 1:
            b_blk = _largest_divisor_le(B, b_blk // 2)
        elif tile_hw % 256 == 0:
            tile_hw //= 2
    assert HW % tile_hw == 0 and B % b_blk == 0
    assert tile_hw % 128 == 0 or tile_hw == HW   # lane-dense stores when possible

    sub = _choose_sub(tile_hw)

    # ---- per-sample scalars & pre-scaled weights (all divisions hoisted) ----
    a = alpha_cos(t, eta).astype(jnp.float32)                      # (B,)
    mu = a
    sigma = jnp.sqrt(1.0 - a ** 2 + eta ** 2)
    scal = jnp.stack([1.0 / sigma, mu / sigma]).astype(jnp.float32)  # (2, B)

    w1t = jnp.transpose(w1).astype(jnp.float32)                    # (hidden, C)
    w1s = w1t[None, :, :] * (1.0 / mu)[:, None, None]              # (B, hidden, C)
    bias = (b1.reshape(1, hidden)
            + (sigma / mu)[:, None] * emb.reshape(1, hidden))      # (B, hidden)
    bias = bias.reshape(B, hidden, 1).astype(jnp.float32)
    w2t = jnp.transpose(w2).astype(jnp.float32)                    # (C, hidden)
    b2c = b2.reshape(C, 1).astype(jnp.float32)

    x_flat = x_nchw.reshape(B, C, HW)                              # native NCHW

    grid = (B // b_blk, HW // tile_hw)

    # ---- VMEM budget: double-buffered x/out blocks + tiny weight blocks ----
    c_pad = -(-C // 8) * 8
    h_pad = -(-hidden // 8) * 8
    io_bytes = 2 * 2 * b_blk * c_pad * tile_hw * 4                 # x + out, 2-buf
    w_bytes = 2 * 4 * (b_blk * h_pad * max(C, 128)                 # W1s
                       + b_blk * h_pad * 128                       # bias
                       + c_pad * max(hidden, 128)                  # W2^T
                       + c_pad * 128)                              # b2
    vmem_limit = int(min(max(io_bytes + w_bytes + (8 << 20), 32 << 20),
                         48 << 20))                                # <= v7x physical

    out_flat = pl.pallas_call(
        functools.partial(eps_edm_kernel, sub=sub),
        out_shape=jax.ShapeDtypeStruct((B, C, HW), x_nchw.dtype),
        grid_spec=pltpu.PrefetchScalarGridSpec(
            num_scalar_prefetch=0,
            grid=grid,
            in_specs=[
                # per-sample scalar table, whole array resident in SMEM
                pl.BlockSpec(memory_space=pltpu.MemorySpace.SMEM),
                # x tokens: (b_blk, C, tile_hw) straight out of NCHW
                pl.BlockSpec((b_blk, C, tile_hw), lambda i, j: (i, 0, j)),
                pl.BlockSpec((b_blk, hidden, C), lambda i, j: (i, 0, 0)),  # W1s
                pl.BlockSpec((b_blk, hidden, 1), lambda i, j: (i, 0, 0)),  # bias
                pl.BlockSpec((C, hidden), lambda i, j: (0, 0)),            # W2^T
                pl.BlockSpec((C, 1), lambda i, j: (0, 0)),                 # b2
            ],
            out_specs=pl.BlockSpec((b_blk, C, tile_hw), lambda i, j: (i, 0, j)),
        ),
        compiler_params=pltpu.CompilerParams(
            dimension_semantics=("parallel", "parallel"),
            vmem_limit_bytes=vmem_limit),
    )(scal, x_flat, w1s, bias, w2t, b2c)

    # Already NCHW -- no transpose needed.
    return out_flat.reshape(B, C, H, W)


# -------------------------- pure-JAX reference ----------------------------- #

def eps_edm_reference(x_nchw, t, params, *, eta=1e-3):
    B, C, H, W = x_nchw.shape
    w1, b1, emb, w2, b2 = params
    a = alpha_cos(t, eta)
    mu = a.reshape(B, 1, 1, 1)
    sigma = jnp.sqrt(1.0 - a ** 2 + eta ** 2).reshape(B, 1, 1, 1)

    x_in = x_nchw / mu                                        # (B,C,H,W)
    c = (sigma / mu)                                          # (B,1,1,1)
    x_tok = jnp.transpose(x_in, (0, 2, 3, 1)).reshape(B, H * W, C)
    h = jax.nn.gelu(x_tok @ w1 + b1 + c.reshape(B, 1, 1) * emb,
                    approximate=True)
    d_tok = h @ w2 + b2
    d = jnp.transpose(d_tok.reshape(B, H, W, C), (0, 3, 1, 2))
    return (mu / sigma) * (x_in - d)


# --------------------------------- main ------------------------------------ #

if __name__ == "__main__":
    B, C, H, W = 2, 4, 16, 16
    hidden = 32
    eta = 1e-3

    key = jax.random.PRNGKey(0)
    k_x, k_t, k_w1, k_b1, k_e, k_w2, k_b2 = jax.random.split(key, 7)

    x = jax.random.normal(k_x, (B, C, H, W), dtype=jnp.float32)
    t = jax.random.uniform(k_t, (B,), dtype=jnp.float32,
                           minval=0.05, maxval=0.95)

    # deterministic synthetic weights for D
    w1 = jax.random.normal(k_w1, (C, hidden), jnp.float32) * 0.2
    b1 = jax.random.normal(k_b1, (1, hidden), jnp.float32) * 0.05
    emb = jax.random.normal(k_e, (1, hidden), jnp.float32) * 0.1
    w2 = jax.random.normal(k_w2, (hidden, C), jnp.float32) * 0.2
    b2 = jax.random.normal(k_b2, (1, C), jnp.float32) * 0.05
    params = (w1, b1, emb, w2, b2)

    out = eps_edm_forward(x, t, params, eta=eta)
    out = jax.block_until_ready(out)

    ref = eps_edm_reference(x, t, params, eta=eta)
    assert out.shape == (B, C, H, W)
    assert jnp.allclose(out, ref, atol=1e-4, rtol=1e-4)

    print("KERNEL_OK")
</pallas_src>

<mosaic_0001>
module attributes {stable_mosaic.version = 11 : i64} {
  func.func @eps_edm_kernel(%arg0: i32, %arg1: i32, %arg2: memref<2x2xf32, #tpu.memory_space<smem>>, %arg3: memref<1x4x256xf32, #tpu.memory_space<vmem>>, %arg4: memref<1x32x4xf32, #tpu.memory_space<vmem>>, %arg5: memref<1x32x1xf32, #tpu.memory_space<vmem>>, %arg6: memref<4x32xf32, #tpu.memory_space<vmem>>, %arg7: memref<4x1xf32, #tpu.memory_space<vmem>>, %arg8: memref<1x4x256xf32, #tpu.memory_space<vmem>>) attributes {dimension_semantics = [#tpu.dimension_semantics<parallel>, #tpu.dimension_semantics<parallel>], iteration_bounds = array<i64: 2, 1>, scalar_prefetch = 0 : i64, scratch_operands = 0 : i64, tpu.core_type = #tpu.core_type<tc>, window_params = [{transform_indices = @transform_0, window_bounds = array<i64: 2, 2>}, {transform_indices = @transform_1, window_bounds = array<i64: 1, 4, 256>}, {transform_indices = @transform_2, window_bounds = array<i64: 1, 32, 4>}, {transform_indices = @transform_3, window_bounds = array<i64: 1, 32, 1>}, {pipeline_mode = #tpu.pipeline_mode<synchronous>, transform_indices = @transform_4, window_bounds = array<i64: 4, 32>}, {pipeline_mode = #tpu.pipeline_mode<synchronous>, transform_indices = @transform_5, window_bounds = array<i64: 4, 1>}, {transform_indices = @transform_6, window_bounds = array<i64: 1, 4, 256>}]} {
    %c0 = arith.constant 0 : index
    %c0_0 = arith.constant 0 : index
    %0 = vector.load %arg6[%c0, %c0_0] : memref<4x32xf32, #tpu.memory_space<vmem>>, vector<4x32xf32>
    %c0_1 = arith.constant 0 : index
    %c0_2 = arith.constant 0 : index
    %1 = vector.load %arg7[%c0_1, %c0_2] : memref<4x1xf32, #tpu.memory_space<vmem>>, vector<4x1xf32>
    %c1_i32 = arith.constant 1 : i32
    %2 = arith.muli %arg0, %c1_i32 : i32
    %c0_i32 = arith.constant 0 : i32
    %3 = arith.addi %2, %c0_i32 : i32
    %c0_3 = arith.constant 0 : index
    %4 = arith.index_cast %3 : i32 to index
    %5 = memref.load %arg2[%c0_3, %4] : memref<2x2xf32, #tpu.memory_space<smem>>
    %c1 = arith.constant 1 : index
    %6 = arith.index_cast %3 : i32 to index
    %7 = memref.load %arg2[%c1, %6] : memref<2x2xf32, #tpu.memory_space<smem>>
    %c0_4 = arith.constant 0 : index
    %c0_5 = arith.constant 0 : index
    %c0_6 = arith.constant 0 : index
    %8 = vector.load %arg4[%c0_4, %c0_5, %c0_6] : memref<1x32x4xf32, #tpu.memory_space<vmem>>, vector<1x32x4xf32>
    %9 = vector.shape_cast %8 : vector<1x32x4xf32> to vector<32x4xf32>
    %c0_7 = arith.constant 0 : index
    %c0_8 = arith.constant 0 : index
    %c0_9 = arith.constant 0 : index
    %10 = vector.load %arg5[%c0_7, %c0_8, %c0_9] : memref<1x32x1xf32, #tpu.memory_space<vmem>>, vector<1x32x1xf32>
    %11 = vector.shape_cast %10 : vector<1x32x1xf32> to vector<32x1xf32>
    %c0_10 = arith.constant 0 : index
    %c0_11 = arith.constant 0 : index
    %c0_12 = arith.constant 0 : index
    %12 = vector.load %arg3[%c0_10, %c0_11, %c0_12] : memref<1x4x256xf32, #tpu.memory_space<vmem>>, vector<1x4x256xf32>
    %13 = vector.shape_cast %12 : vector<1x4x256xf32> to vector<4x256xf32>
    %cst = arith.constant dense<0.000000e+00> : vector<32x256xf32>
    %14 = tpu.matmul %9, %13, %cst {dimension_numbers = #tpu.dot_dimension_numbers<[1], [0], [0], [1], [0, 0, 1, 1], [], []>} : vector<32x4xf32>, vector<4x256xf32>, vector<32x256xf32> -> vector<32x256xf32>
    %15 = vector.broadcast %11 : vector<32x1xf32> to vector<32x256xf32>
    %16 = arith.addf %14, %15 : vector<32x256xf32>
    %17 = arith.mulf %16, %16 : vector<32x256xf32>
    %18 = arith.mulf %16, %17 : vector<32x256xf32>
    %cst_13 = arith.constant 4.471500e-02 : f32
    %19 = vector.broadcast %cst_13 : f32 to vector<32x256xf32>
    %20 = arith.mulf %19, %18 : vector<32x256xf32>
    %21 = arith.addf %16, %20 : vector<32x256xf32>
    %cst_14 = arith.constant 0.797884583 : f32
    %22 = vector.broadcast %cst_14 : f32 to vector<32x256xf32>
    %23 = arith.mulf %22, %21 : vector<32x256xf32>
    %24 = math.tanh %23 : vector<32x256xf32>
    %cst_15 = arith.constant 1.000000e+00 : f32
    %25 = vector.broadcast %cst_15 : f32 to vector<32x256xf32>
    %26 = arith.addf %25, %24 : vector<32x256xf32>
    %cst_16 = arith.constant 5.000000e-01 : f32
    %27 = vector.broadcast %cst_16 : f32 to vector<32x256xf32>
    %28 = arith.mulf %27, %26 : vector<32x256xf32>
    %29 = arith.mulf %16, %28 : vector<32x256xf32>
    %cst_17 = arith.constant dense<0.000000e+00> : vector<4x256xf32>
    %30 = tpu.matmul %0, %29, %cst_17 {dimension_numbers = #tpu.dot_dimension_numbers<[1], [0], [0], [1], [0, 0, 1, 1], [], []>} : vector<4x32xf32>, vector<32x256xf32>, vector<4x256xf32> -> vector<4x256xf32>
    %31 = vector.broadcast %1 : vector<4x1xf32> to vector<4x256xf32>
    %32 = arith.addf %30, %31 : vector<4x256xf32>
    %33 = vector.broadcast %5 : f32 to vector<4x256xf32>
    %34 = arith.mulf %33, %13 : vector<4x256xf32>
    %35 = vector.broadcast %7 : f32 to vector<4x256xf32>
    %36 = arith.mulf %35, %32 : vector<4x256xf32>
    %37 = arith.subf %34, %36 : vector<4x256xf32>
    %c0_18 = arith.constant 0 : index
    %c0_19 = arith.constant 0 : index
    %c0_20 = arith.constant 0 : index
    %38 = vector.load %arg8[%c0_18, %c0_19, %c0_20] : memref<1x4x256xf32, #tpu.memory_space<vmem>>, vector<1x4x256xf32>
    %39 = vector.shape_cast %38 : vector<1x4x256xf32> to vector<4x256xf32>
    %40 = vector.shape_cast %37 : vector<4x256xf32> to vector<1x4x256xf32>
    tpu.vector_store %arg8[%c0_18, %c0_19, %c0_20], %40 {strides = array<i32>} : memref<1x4x256xf32, #tpu.memory_space<vmem>>, vector<1x4x256xf32>,
    return
  }
  func.func @transform_0(%arg0: i32, %arg1: i32) -> (i32, i32) {
    %c0_i32 = arith.constant 0 : i32
    %c0_i32_0 = arith.constant 0 : i32
    %c0_i32_1 = arith.constant 0 : i32
    return %c0_i32, %c0_i32_0 : i32, i32
  }
  func.func @transform_1(%arg0: i32, %arg1: i32) -> (i32, i32, i32) {
    %c0_i32 = arith.constant 0 : i32
    %c0_i32_0 = arith.constant 0 : i32
    return %arg0, %c0_i32, %arg1 : i32, i32, i32
  }
  func.func @transform_2(%arg0: i32, %arg1: i32) -> (i32, i32, i32) {
    %c0_i32 = arith.constant 0 : i32
    %c0_i32_0 = arith.constant 0 : i32
    %c0_i32_1 = arith.constant 0 : i32
    return %arg0, %c0_i32, %c0_i32_0 : i32, i32, i32
  }
  func.func @transform_3(%arg0: i32, %arg1: i32) -> (i32, i32, i32) {
    %c0_i32 = arith.constant 0 : i32
    %c0_i32_0 = arith.constant 0 : i32
    %c0_i32_1 = arith.constant 0 : i32
    return %arg0, %c0_i32, %c0_i32_0 : i32, i32, i32
  }
  func.func @transform_4(%arg0: i32, %arg1: i32) -> (i32, i32) {
    %c0_i32 = arith.constant 0 : i32
    %c0_i32_0 = arith.constant 0 : i32
    %c0_i32_1 = arith.constant 0 : i32
    return %c0_i32, %c0_i32_0 : i32, i32
  }
  func.func @transform_5(%arg0: i32, %arg1: i32) -> (i32, i32) {
    %c0_i32 = arith.constant 0 : i32
    %c0_i32_0 = arith.constant 0 : i32
    %c0_i32_1 = arith.constant 0 : i32
    return %c0_i32, %c0_i32_0 : i32, i32
  }
  func.func @transform_6(%arg0: i32, %arg1: i32) -> (i32, i32, i32) {
    %c0_i32 = arith.constant 0 : i32
    %c0_i32_0 = arith.constant 0 : i32
    return %arg0, %c0_i32, %arg1 : i32, i32, i32
  }
}

</mosaic_0001>

<bundles_post_ra>
// kernel: tpu_custom_call.1
= control target key start
LH: loop header
LB: loop body
LE: loop exit
PB: predicated region body
PF: predicated region fallthrough
CT: control target
= control target key end

     0   :  { %11 = vsyncpa [#allocation4], 0  ;;  %s1219_s0 = inlined_call_operand.vmem [shape: f32[2,2], index: 0, kind: input, shape index: {}]   ;;  %s1220_s1 = inlined_call_operand.vmem [shape: f32[2,4,256], index: 1, kind: input, shape index: {}]   ;;  %s1221_s2 = inlined_call_operand.vmem [shape: f32[2,32,4], index: 2, kind: input, shape index: {}]   ;;  %s1222_s3 = inlined_call_operand.vmem [shape: f32[2,32,1], index: 3, kind: input, shape index: {}]   ;;  %s1223_s4 = inlined_call_operand.vmem [shape: f32[4,32], index: 4, kind: input, shape index: {}]   ;;  %s1224_s5 = inlined_call_operand.vmem [shape: f32[4,1], index: 5, kind: input, shape index: {}]   ;;  %s1225_s6 = inlined_call_operand.hbm [shape: f32[2,4,256], index: 6, kind: output, shape index: {}]  }
   0x1   :  { %12 = vsyncpa [#allocation3], 0 }
   0x2   :  { %14 = vsyncpa [#allocation3 + $0x1], 0  ;;  %s1032_s21 = smov 0   ;;  %s1034_s22 = smov 0  }
   0x3   :  { %s1036_s23 = smov 0   ;;  %s1038_s24 = smov 0  }
   0x4   :  { %s1040_s25 = smov 0   ;;  %s1042_s26 = smov 0  }
   0x5 LB: > { %s776_s27 = sadd.s32 4294967295, %s991_s26   ;;  %s777_s28 = sadd.s32 4294967294, %s991_s26   ;;  %s991_s26 = sphi %s1042_s26, %s20_s26   ;;  %s987_s25 = sphi %s1040_s25, %s1234_s25   ;;  %s983_s24 = sphi %s1038_s24, %s1233_s24   ;;  %s979_s23 = sphi %s1036_s23, %s1232_s23   ;;  %s975_s22 = sphi %s1034_s22, %s1231_s22   ;;  %s971_s21 = sphi %s1032_s21, %s1230_s21  }
   0x6   : > { %s32_s29 = sadd.s32 1, %s987_s25  ;;  %s184_s30 = sadd.s32 1, %s979_s23 }
   0x7   : > { %p34_p0 = scmp.ge.s32.totalorder %s32_s29, 2  ;;  %p194_p1 = scmp.ne.s32.totalorder %s979_s23, %s975_s22 }
   0x8   : > { %p195_p2 = scmp.eq.s32.totalorder %s776_s27, 1  ;;  %p200_p3 = scmp.ne.s32.totalorder %s975_s22, %s971_s21 }
   0x9   : > { %s1236_s29 = smov (%p34_p0, %s32_s29), 0  ;;  %p201_p5 = scmp.eq.s32.totalorder %s777_s28, 1 }
   0xa   : > { %p1072_p4 = por %p195_p2, %p194_p1  ;;  %s179_s8 = ssub.s32 %s987_s25, %s1236_s29 }
   0xb   : > { %p778_p6 = scmp.ge.s32.totalorder %s991_s26, 1  ;;  %p182_p7 = scmp.eq.s32.totalorder %s179_s8, 0 }
   0xc   : > { %p1079_p8 = por %p201_p5, %p200_p3  ;;  %p208_p9 = scmp.lt.s32.totalorder %s991_s26, 3 }
   0xd   : > { %s1085_s10 = scalar_select %p182_p7, %s979_s23, %s184_s30  }
   0xe   : > { %p1087_p10 = pnand %p778_p6, %p208_p9  ;;  %p1091_p11 = scmp.eq.s32.totalorder %s776_s27, 0 }
   0xf   : > { %s221_s15 = sshll.u32 %s1219_s0, 4  ;;  %s222_s15 = int_to_ptr.vmem [resolvable:$true] %s221_s15 }
  0x10   : > { %p815_p12 = pneg %p1087_p10  ;;  %s896_s16 = scalar_lea.vmem %s222_s15, 32 }
  0x11   : > { %p897_p0 = scmp.ne.s32.totalorder %s222_s15, %s896_s16  ;;  %p904_p5 = scmp.lt.s32.totalorder %s222_s15, %s222_s15 }
  0x12   : > { %p816_p13 = pnand %p1091_p11, %p815_p12  ;;  %p905_p6 = scmp.lt.s32.totalorder %s896_s16, %s896_s16 }
  0x14   : > { %p898_p1 = pneg %p816_p13  ;;  %p906_p7 = por %p905_p6, %p904_p5 }
  0x16   : > { %p899_p2 = pnand %p898_p1, %p897_p0 }
  0x18   : > { %p900_p3 = pneg %p899_p2 }
  0x1a   : > { %p907_p9 = pnand %p906_p7, %p900_p3 }
  0x1c   : > { %910 = shalt.err (!%p907_p9)
}
  0x1d   : > { %s993_s17 = smov [#allocation2]   ;;  %269 = sbr.rel (%p1087_p10) target bundleno = 511 (0x1ff), region = 44 }
  0x1e   : > { %818 = dma.vmem_to_smem (!%p816_p13), %s222_s15, 32, %s993_s17, [#allocation4]  }
  0x22   : > { %962 = dma.done.wait (%p1091_p11), [#allocation4], 32  }
  0x23   : > { %964 = vsyncadd (%p1091_p11), [#allocation4], 4294967264 }
  0x24   : > { %275 = sfence }
  0x25   : > { %p315_p12 = scmp.lt.s32.totalorder %s983_s24, 1  ;;  %v994_v0 = vmov 0.0   ;;  %v995_v1 = vmov 0   ;;  %vm390_vm0 = vcmask 1043456   ;;  %vm377_vm1 = vcmask 31744   ;;  %s337_s11 = sld [smem:[#allocation2 + %s983_s24]] }
  0x26   : > { %459 = vmatprep.mubr.f32.mxu0 %v994_v0  ;;  %878 = vset.pattern.permute.xlu1 %v995_v1  ;;  %v336_v10 = vld [vmem:[%s1224_s5] sm:$0xf]  ;;  %vm561_vm2 = vcmask 261120   ;;  %s311_s13 = sand.u32 1, %s975_s22  }
  0x27   : > { %s316_s18 = scalar_select %p315_p12, %s983_s24, 1  ;;  %877 = vset.pattern.permute.xlu0 %v995_v1  ;;  %629 = vmatprep.mubr.f32.mxu1 %v994_v0 }
  0x28   : > { %s783_s14 = sshll.u32 %s311_s13, 3 }
  0x29   : > { %s803_s19 = sshll.u32 %s316_s18, 3  ;;  %s804_s20 = sshll.u32 %s316_s18, 5 }
  0x2a   : > { %s322_s30 = scalar_lea.vmem %s1220_s1, %s803_s19  ;;  %s328_s12 = scalar_lea.vmem %s1221_s2, %s804_s20 }
  0x2b   : > { %v1116_v2 = vld [vmem:[%s322_s30] sm:$0xff]  ;;  %s333_s15 = scalar_lea.vmem %s1222_s3, %s804_s20  ;;  %v347_v9 = vld [vmem:[%s328_s12 + $0x8] sm:$0xff]  ;;  %v348_v11 = vld [vmem:[%s328_s12 + $0x10] sm:$0xff]  ;;  %s338_s20 = sshra.s32 %s983_s24, 7 }
  0x2c   : > { %v376_v3 = vcombine.high %v1116_v2, %v1116_v2  ;;  %v351_v4 = vld [vmem:[%s333_s15 + $0x8] sm:$0xff]  ;;  %v346_v5 = vld [vmem:[%s328_s12] sm:$0xff]  ;;  %v353_v6 = vld [vmem:[%s333_s15 + $0x18] sm:$0xff]  ;;  %s806_s27 = sshll.u32 %s338_s20, 7  ;;  %s343_s30 = sand.u32 127, %s983_s24 }
  0x2d   : > { %362 = vperm.xlu1 %878, %v351_v4   ;;  %v350_v7 = vld [vmem:[%s333_s15] sm:$0xff]  ;;  %372 = vperm.xlu0 %877, %v353_v6   ;;  %v352_v8 = vld [vmem:[%s333_s15 + $0x10] sm:$0xff]  ;;  %v349_v12 = vld [vmem:[%s328_s12 + $0x18] sm:$0xff]  ;;  %s807_s28 = sadd.s32 128, %s806_s27  ;;  %s808_s15 = sshll.u32 %s983_s24, 7 }
  0x2e   : > { %791 = vmatprep.subr.msk.mxu0 %vm390_vm0, %v376_v3  ;;  %s344_s8 = sadd.s32 %s807_s28, %s343_s30  ;;  %s313_s16 = scalar_lea.vmem [#allocation5], %s783_s14 }
  0x2f   : > { %792 = vmatpush1.msk.msra.mxu0 %vm390_vm0, %v1116_v2  ;;  %s345_s12 = sld [smem:[#allocation2 + %s344_s8]]  ;;  %s664_s17 = sshll.u32 %s313_s16, 4  ;;  %s665_s17 = int_to_ptr.vmem [resolvable:$true] %s664_s17 }
  0x30   : > { %793 = vmatmul.mubr.msk.f32.vlgmr.msra.gmra.mxu0 %vm377_vm1, %v346_v5  ;;  %s662_s20 = scalar_lea.hbm %s1225_s6, %s808_s15  ;;  %s648_s27 = scalar_lea.sflag [#allocation3], %s311_s13 }
  0x31   : > { %465 = vmatprep.mubr.f32.mxu0 %v994_v0  ;;  %357 = vperm.xlu1 %878, %v350_v7   ;;  %s911_s28 = scalar_lea.vmem %s665_s17, 128  ;;  %s996_s30 = smov [#allocation5]  }
  0x32   : > { %367 = vperm.xlu0 %877, %v352_v8   ;;  %p912_p10 = scmp.ne.s32.totalorder %s665_s17, %s911_s28  ;;  %s915_s8 = sshll.u32 %s996_s30, 4  ;;  %s916_s8 = int_to_ptr.vmem [resolvable:$false] %s915_s8 }
  0x33   : > { %s917_s24 = scalar_lea.vmem %s916_s8, 256  ;;  %p918_p0 = scmp.lt.s32.totalorder %s665_s17, %s916_s8 }
  0x34   : > { %794 = vmatmul.mubr.msk.f32.gmra.mxu0 %vm377_vm1, %v347_v9  ;;  %p913_p11 = pnand %p912_p10, %p1072_p4  ;;  %p919_p1 = scmp.lt.s32.totalorder %s917_s24, %s911_s28 }
  0x35   : > { %471 = vmatprep.mubr.f32.mxu0 %v994_v0 }
  0x36   : > { %558 = vperm.xlu0 %877, %v336_v10   ;;  %p914_p13 = pneg %p913_p11  ;;  %p920_p2 = por %p919_p1, %p918_p0 }
  0x38   : > { %795 = vmatmul.mubr.msk.f32.gmra.mxu0 %vm377_vm1, %v348_v11  ;;  %p921_p3 = pnand %p920_p2, %p914_p13 }
  0x39   : > { %477 = vmatprep.mubr.f32.mxu0 %v994_v0 }
  0x3c   : > { %796 = vmatmul.mubr.msk.f32.gmra.mxu0 %vm377_vm1, %v349_v12 }
  0xa8   : > { %v363_v13 = vpop.permute.xlu1 %362  ;;  %v373_v16 = vpop.permute.xlu0 %372 }
  0xac   : > { %v358_v15 = vpop.permute.xlu1 %357 }
  0xad   : > { %v368_v27 = vpop.permute.xlu0 %367 }
  0xf0   : > { %v461_v14 = vpop.f32.mrf.mxu0 }
  0xf1   : > { %v1133_v19 = vadd.f32 %v461_v14, %v358_v15 }
  0xf2   : > { %v463_v17 = vpop.f32.mrf.mxu0 }
  0xf3   : > { %v1131_v18 = vadd.f32 %v463_v17, %v358_v15  ;;  %v484_v28 = vmul.f32 %v1133_v19, %v1133_v19 }
  0xf4   : > { %v467_v20 = vpop.f32.mrf.mxu0 }
  0xf5   : > { %v485_v21 = vmul.f32 %v1131_v18, %v1131_v18  ;;  %v1137_v22 = vadd.f32 %v467_v20, %v363_v13  ;;  %v492_v37 = vmul.f32 %v484_v28, %v1133_v19 }
  0xf6   : > { %v469_v23 = vpop.f32.mrf.mxu0 }
  0xf7   : > { %v493_v24 = vmul.f32 %v485_v21, %v1131_v18  ;;  %v486_v25 = vmul.f32 %v1137_v22, %v1137_v22  ;;  %v1142_v26 = vadd.f32 %v469_v23, %v363_v13  ;;  %v500_v49 = vmul.f32 0.044715, %v492_v37 }
  0xf8   : > { %v473_v29 = vpop.f32.mrf.mxu0 }
  0xf9   : > { %v501_v30 = vmul.f32 0.044715, %v493_v24  ;;  %v494_v31 = vmul.f32 %v486_v25, %v1137_v22  ;;  %v487_v32 = vmul.f32 %v1142_v26, %v1142_v26  ;;  %v1149_v33 = vadd.f32 %v473_v29, %v368_v27 }
  0xfa   : > { %v475_v34 = vpop.f32.mrf.mxu0  ;;  %v508_v61 = vadd.f32 %v500_v49, %v1133_v19 }
  0xfb   : > { %v502_v35 = vmul.f32 0.044715, %v494_v31  ;;  %v495_v36 = vmul.f32 %v487_v32, %v1142_v26  ;;  %v488_v38 = vmul.f32 %v1149_v33, %v1149_v33  ;;  %v1155_v39 = vadd.f32 %v475_v34, %v368_v27 }
  0xfc   : > { %v479_v40 = vpop.f32.mrf.mxu0  ;;  %v509_v41 = vadd.f32 %v501_v30, %v1131_v18  ;;  %v516_v7 = vmul.f32 0.7978846, %v508_v61 }
  0xfd   : > { %v503_v42 = vmul.f32 0.044715, %v495_v36  ;;  %v510_v43 = vadd.f32 %v502_v35, %v1137_v22  ;;  %v496_v44 = vmul.f32 %v488_v38, %v1149_v33  ;;  %v489_v45 = vmul.f32 %v1155_v39, %v1155_v39 }
  0xfe   : > { %v480_v46 = vadd.f32 %v479_v40, %v373_v16  ;;  %v481_v47 = vpop.f32.mrf.mxu0  ;;  %v517_v53 = vmul.f32 0.7978846, %v509_v41 }
  0xff   : > { %v482_v48 = vadd.f32 %v481_v47, %v373_v16  ;;  %v504_v50 = vmul.f32 0.044715, %v496_v44  ;;  %v497_v51 = vmul.f32 %v489_v45, %v1155_v39  ;;  %v511_v54 = vadd.f32 %v503_v42, %v1142_v26 }
 0x100   : > { %v490_v52 = vmul.f32 %v480_v46, %v480_v46  ;;  %v518_v56 = vmul.f32 0.7978846, %v510_v43  ;;  %880 = vtanh.f32 %v517_v53  ;;  %v638_v47 = vstv %s345_s12 }
 0x101   : > { %v491_v55 = vmul.f32 %v482_v48, %v482_v48  ;;  %v512_v57 = vadd.f32 %v504_v50, %v1149_v33  ;;  %v505_v58 = vmul.f32 0.044715, %v497_v51  ;;  %v519_v1 = vmul.f32 0.7978846, %v511_v54 }
 0x102   : > { %v498_v59 = vmul.f32 %v490_v52, %v480_v46  ;;  %882 = vtanh.f32 %v518_v56 }
 0x103   : > { %v499_v60 = vmul.f32 %v491_v55, %v482_v48  ;;  %v520_v62 = vmul.f32 0.7978846, %v512_v57  ;;  %v513_v63 = vadd.f32 %v505_v58, %v1155_v39 }
 0x104   : > { %v506_v0 = vmul.f32 0.044715, %v498_v59 }
 0x105   : > { %v507_v3 = vmul.f32 0.044715, %v499_v60  ;;  %v521_v4 = vmul.f32 0.7978846, %v513_v63  ;;  %884 = vtanh.f32 %v520_v62 }
 0x106   : > { %v514_v5 = vadd.f32 %v506_v0, %v480_v46 }
 0x107   : > { %v515_v6 = vadd.f32 %v507_v3, %v482_v48  ;;  %886 = vtanh.f32 %v521_v4 }
 0x108   : > { %v522_v8 = vmul.f32 0.7978846, %v514_v5  ;;  %888 = vtanh.f32 %v519_v1 }
 0x109   : > { %v523_v9 = vmul.f32 0.7978846, %v515_v6 }
 0x10a   : > { %890 = vtanh.f32 %v522_v8 }
 0x10b   : > { %892 = vtanh.f32 %v523_v9 }
 0x10c   : > { %894 = vtanh.f32 %v516_v7 }
 0x10d   : > { %v881_v10 = vpop.eup %880 }
 0x10e   : > { %v533_v31 = vadd.f32 1.0, %v881_v10 }
 0x10f   : > { %v883_v11 = vpop.eup %882 }
 0x110   : > { %v534_v28 = vadd.f32 1.0, %v883_v11  ;;  %v541_v41 = vmul.f32 0.5, %v533_v31 }
 0x112   : > { %v885_v12 = vpop.eup %884  ;;  %v542_v38 = vmul.f32 0.5, %v534_v28 }
 0x113   : > { %v536_v21 = vadd.f32 1.0, %v885_v12 }
 0x114   : > { %v887_v13 = vpop.eup %886  ;;  %v550_v45 = vmul.f32 %v542_v38, %v1137_v22 }
 0x115   : > { %v889_v14 = vpop.eup %888  ;;  %v537_v16 = vadd.f32 1.0, %v887_v13  ;;  %v544_v32 = vmul.f32 0.5, %v536_v21 }
 0x116   : > { %v535_v25 = vadd.f32 1.0, %v889_v14 }
 0x117   : > { %v891_v15 = vpop.eup %890  ;;  %v545_v30 = vmul.f32 0.5, %v537_v16  ;;  %v552_v42 = vmul.f32 %v544_v32, %v1149_v33  ;;  %v335_v33 = vld [vmem:[%s1223_s4] sm:$0xf] }
 0x118   : > { %v893_v17 = vpop.eup %892  ;;  %v538_v20 = vadd.f32 1.0, %v891_v15  ;;  %v543_v36 = vmul.f32 0.5, %v535_v25 }
 0x119   : > { %v895_v23 = vpop.eup %894  ;;  %v539_v24 = vadd.f32 1.0, %v893_v17  ;;  %v553_v40 = vmul.f32 %v545_v30, %v1155_v39 }
 0x11a   : > { %v546_v27 = vmul.f32 0.5, %v538_v20  ;;  %v532_v34 = vadd.f32 1.0, %v895_v23  ;;  %v551_v44 = vmul.f32 %v543_v36, %v1142_v26  ;;  %v636_v26 = vstv %s337_s11 }
 0x11b   : > { %v547_v29 = vmul.f32 0.5, %v539_v24  ;;  %v637_v50 = vmul.f32 %v636_v26, %v1116_v2 }
 0x11c   : > { %v554_v37 = vmul.f32 %v546_v27, %v480_v46  ;;  %v540_v43 = vmul.f32 0.5, %v532_v34  ;;  %v549_v46 = vmul.f32 %v541_v41, %v1131_v18  ;;  %v559_v18 = vpop.permute.xlu0 %558 }
 0x11d   : > { %v555_v35 = vmul.f32 %v547_v29, %v482_v48 }
 0x11e   : > { %v548_v39 = vmul.f32 %v540_v43, %v1133_v19 }
 0x11f   : > { %589 = vmatprep.subr.mxu1 %v555_v35 }
 0x120   : > { %590 = vmatpush1.msra.mxu1 %v554_v37 }
 0x121   : > { %591 = vmatprep.subr.mxu1 %v553_v40 }
 0x122   : > { %592 = vmatpush1.msra.mxu1 %v552_v42 }
 0x123   : > { %593 = vmatprep.subr.mxu1 %v551_v44 }
 0x124   : > { %594 = vmatpush1.msra.mxu1 %v550_v45 }
 0x125   : > { %595 = vmatprep.subr.mxu1 %v549_v46 }
 0x126   : > { %596 = vmatpush1.msra.mxu1 %v548_v39 }
 0x127   : > { %797 = vmatmul.mubr.msk.f32.vlgmr.msra.gmra.mxu1 %vm561_vm2, %v335_v33 }
 0x1e7   : > { %v631_v22 = vpop.f32.mrf.mxu1 }
 0x1e8   : > { %v632_v19 = vadd.f32 %v631_v22, %v559_v18 }
 0x1e9   : > { %v633_v48 = vpop.f32.mrf.mxu1 }
 0x1ea   : > { %v634_v49 = vadd.f32 %v633_v48, %v559_v18  ;;  %v639_v51 = vmul.f32 %v638_v47, %v632_v19 }
 0x1ec   : > { %v640_v52 = vmul.f32 %v638_v47, %v634_v49 }
 0x1ee   : > { %v643_v53 = vcombine.low %v639_v51, %v640_v52 }
 0x1f0   : > { %v645_v54 = vsub.f32 %v637_v50, %v643_v53 }
 0x1f2   : > { %646 = vst [vmem:[%s313_s16] sm:$0xff] %v645_v54 }
 0x1f3   : > { %924 = shalt.err (!%p921_p3)
}
 0x1f4   : > { %s925_s11 = scalar_lea.hbm %s662_s20, 128  ;;  %s929_s14 = scalar_lea.hbm %s1225_s6, 256 }
 0x1f5   : > { %p926_p5 = scmp.ne.s32.totalorder %s662_s20, %s925_s11  ;;  %p930_p9 = scmp.lt.s32.totalorder %s662_s20, %s1225_s6 }
 0x1f6   : > { %p931_p12 = scmp.lt.s32.totalorder %s929_s14, %s925_s11 }
 0x1f7   : > { %p927_p6 = pnand %p926_p5, %p1072_p4 }
 0x1f8   : > { %p932_p10 = por %p931_p12, %p930_p9 }
 0x1f9   : > { %p928_p7 = pneg %p927_p6 }
 0x1fb   : > { %p933_p11 = pnand %p932_p10, %p928_p7 }
 0x1fd   : > { %936 = shalt.err (!%p933_p11)
}
 0x1fe   : > { %813 = dma.vmem_to_hbm [thread:$0]  (%p1072_p4), %s665_s17, 128, %s662_s20, %s648_s27  }
 0x1ff PF: > { %p825_p13 = scmp.ge.s32.totalorder %s991_s26, 2  ;;  %s676_s18 = sand.u32 1, %s971_s21  }
 0x200   : > { %s677_s19 = scalar_lea.sflag [#allocation3], %s676_s18 }
 0x201   : > { %p820_p0 = pnand %p825_p13, %p1079_p8 }
 0x203   : > { %p821_p1 = pneg %p820_p0 }
 0x205   : > { %966 = dma.done.wait (%p821_p1), %s677_s19, 128  }
 0x206   : > { %968 = vsyncadd (%p821_p1), %s677_s19, 4294967168  ;;  %s20_s26 = sadd.s32 1, %s991_s26   ;;  %s1230_s21 = smov %s975_s22 }
 0x207   : > { %p17_p2 = scmp.ge.s32.totalorder %s20_s26, 4   ;;  %s1231_s22 = smov %s979_s23 }
 0x208   : > { %s1232_s23 = smov %s1085_s10  ;;  %s1233_s24 = smov %s987_s25 }
 0x209   : > { %s1234_s25 = smov %s1236_s29  ;;  %19 = sbr.rel (!%p17_p2) target bundleno = 5 (0x5), region = 90 }
 0x20e   :  { %682 = vsyncpa [#allocation3], 1 }
 0x20f   :  { %684 = vsyncpa [#allocation3 + $0x1], 1 }
 0x210   :  { %685 = vsyncpa [#allocation4], 1 }
 0x211   :  { %687 = vsyncpa [#allocation4 + $0x1], 1 }

</bundles_post_ra>
